<compile_context>
chip_gen: v7x
topology: tpu7x:2x2x1
jax: 0.10.0
libtpu: 0.0.40
codegen_flags: <defaults>
</compile_context>

<pallas_src>
import math

import jax
import jax.numpy as jnp
from jax import lax
from jax.experimental import pallas as pl
from jax.experimental.pallas import tpu as pltpu


def _round_up(x, m):
    return ((x + m - 1) // m) * m


# ---------------------------------------------------------------------------
# Kernel 1: GCNConv(in_channels, 1) score layer, row-tiled, normalization fused
#   score[i] = d[i] * sum_j A_hat[i, j] * (d[j] * xw[j]) + b
# ---------------------------------------------------------------------------
def _gcn_score_kernel(a_ref, v_ref, d_ref, b_ref, out_ref):
    # a_ref: (TM, N) raw A_hat row tile   (HBM-bandwidth-bound stream)
    # v_ref: (N, 1)  = d_inv_sqrt * (X @ W), resident across all tiles
    # d_ref: (TM, 1) = d_inv_sqrt rows for this tile
    # b_ref: (1, 1)  bias scalar in SMEM
    agg = jnp.dot(a_ref[...], v_ref[...], preferred_element_type=jnp.float32)  # (TM, 1)
    out_ref[...] = d_ref[...] * agg + b_ref[0, 0]


def gcn_score(a_hat, d_inv_sqrt, xw, b, block_rows=None):
    """Returns score [N, 1] = D^{-1/2} A_hat D^{-1/2} (X W) + b, matvec on TPU."""
    N = a_hat.shape[0]
    if block_rows is None:
        # ~8 MiB per A-tile buffer (2 buffers => ~16 MiB), multiple of 8 rows,
        # capped at 512 rows; stays well under v7x's 64 MiB VMEM.
        bytes_per_row = N * 4
        block_rows = max(8, min(512, ((8 << 20) // bytes_per_row) // 8 * 8))
    block_rows = min(block_rows, _round_up(N, 8))
    n_pad = _round_up(N, block_rows)

    a_p = jnp.pad(a_hat, ((0, n_pad - N), (0, 0)))
    d_col = d_inv_sqrt.reshape(N, 1).astype(jnp.float32)
    d_p = jnp.pad(d_col, ((0, n_pad - N), (0, 0)))
    v = d_col * xw                                  # tiny [N, 1], computed once

    grid = (n_pad // block_rows,)
    score_p = pl.pallas_call(
        _gcn_score_kernel,
        out_shape=jax.ShapeDtypeStruct((n_pad, 1), jnp.float32),
        grid=grid,
        in_specs=[
            pl.BlockSpec((block_rows, N), lambda i: (i, 0)),           # A row tile
            pl.BlockSpec((N, 1), lambda i: (0, 0)),                    # v (resident)
            pl.BlockSpec((block_rows, 1), lambda i: (i, 0)),           # d rows
            pl.BlockSpec(memory_space=pltpu.MemorySpace.SMEM),         # bias scalar
        ],
        out_specs=pl.BlockSpec((block_rows, 1), lambda i: (i, 0)),
        compiler_params=pltpu.CompilerParams(
            dimension_semantics=("parallel",),       # shards row tiles on v7x 2 TCs
            vmem_limit_bytes=48 * 1024 * 1024,
        ),
    )(a_p, v, d_p, b)
    return score_p[:N]


# ---------------------------------------------------------------------------
# Kernel 2: x_out = x[perm] * tanh(score[perm]), vectorized gather via one-hot
#           selection matmul on the MXU, tiled over k.
# ---------------------------------------------------------------------------
def _gather_scale_kernel(perm_ref, x_ref, score_ref, out_ref):
    # perm_ref: (TK, 1) int32 node indices for this output tile
    # x_ref:    (N, C)  node features (resident across tiles)
    # score_ref:(N, 1)  raw scores (resident across tiles)
    # out_ref:  (TK, C)
    n = x_ref.shape[0]
    tk = out_ref.shape[0]
    col_ids = lax.broadcasted_iota(jnp.int32, (tk, n), 1)
    onehot = (col_ids == perm_ref[...]).astype(jnp.float32)            # (TK, N)
    gx = jnp.dot(onehot, x_ref[...].astype(jnp.float32),
                 preferred_element_type=jnp.float32)                   # (TK, C)
    gs = jnp.dot(onehot, score_ref[...],
                 preferred_element_type=jnp.float32)                   # (TK, 1)
    out_ref[...] = (gx * jnp.tanh(gs)).astype(out_ref.dtype)


def gather_scale(x, score, perm, k, block_k=128):
    # TODO(synk): for very large N (x not VMEM-resident on v7x), switch to a
    # scalar-prefetch perm-driven index_map DMA gather instead of the one-hot matmul.
    N, C = x.shape
    tk = min(block_k, _round_up(k, 8))
    k_pad = _round_up(k, tk)
    perm_p = jnp.pad(perm.astype(jnp.int32), (0, k_pad - k)).reshape(k_pad, 1)

    grid = (k_pad // tk,)
    out_p = pl.pallas_call(
        _gather_scale_kernel,
        out_shape=jax.ShapeDtypeStruct((k_pad, C), x.dtype),
        grid=grid,
        in_specs=[
            pl.BlockSpec((tk, 1), lambda i: (i, 0)),     # perm tile
            pl.BlockSpec((N, C), lambda i: (0, 0)),      # x (resident, fetched once)
            pl.BlockSpec((N, 1), lambda i: (0, 0)),      # score (resident)
        ],
        out_specs=pl.BlockSpec((tk, C), lambda i: (i, 0)),
        compiler_params=pltpu.CompilerParams(
            dimension_semantics=("parallel",),
            vmem_limit_bytes=48 * 1024 * 1024,
        ),
    )(perm_p, x, score)
    return out_p[:k]


# ---------------------------------------------------------------------------
# SAGPool forward
# ---------------------------------------------------------------------------
def sag_pool(x, edge_index, edge_attr, w, b, ratio=0.8, block_rows=None, block_k=128):
    N, _ = x.shape
    src, dst = edge_index[0], edge_index[1]

    # --- glue: dense A_hat = A + I  (messages flow source -> target).
    a_hat = (jnp.zeros((N, N), jnp.float32).at[dst, src].add(1.0)
             + jnp.eye(N, dtype=jnp.float32))
    deg = jnp.sum(a_hat, axis=1)                       # in-degree + self loop
    d_inv_sqrt = jnp.where(deg > 0.0, lax.rsqrt(deg), 0.0)

    # xw computed once (tiny [N,1]); avoids re-streaming X per row tile.
    xw = jnp.dot(x, w, preferred_element_type=jnp.float32)

    # --- Pallas kernel 1: score = GCNConv(x, edge_index)  -> [N, 1]
    score = gcn_score(a_hat, d_inv_sqrt, xw, b, block_rows=block_rows)
    score_flat = score[:, 0]                           # .squeeze()

    # --- topk(score, ratio, batch) with batch == zeros (single graph)
    k = int(math.ceil(ratio * N))
    _, perm = lax.top_k(score_flat, k)                 # descending order
    perm = perm.astype(jnp.int32)

    # --- Pallas kernel 2: x = x[perm] * tanh(score[perm]).view(-1, 1)
    x_out = gather_scale(x, score, perm, k, block_k=block_k)

    batch = jnp.zeros((N,), jnp.int32)
    batch_out = batch[perm]

    # --- filter_adj: keep edges whose endpoints both survive, relabel nodes.
    # TODO(synk): PyTorch compacts edges to a data-dependent [2, E'] shape; with
    # static shapes we return relabeled [2, E] with -1 on dropped edges plus a mask.
    new_id = jnp.full((N,), -1, jnp.int32).at[perm].set(jnp.arange(k, dtype=jnp.int32))
    keep = (new_id[src] >= 0) & (new_id[dst] >= 0)
    edge_index_out = jnp.where(keep[None, :],
                               jnp.stack([new_id[src], new_id[dst]]),
                               jnp.int32(-1))
    edge_attr_out = None if edge_attr is None else jnp.where(
        keep.reshape((-1,) + (1,) * (edge_attr.ndim - 1)), edge_attr, 0)

    return x_out, edge_index_out, edge_attr_out, batch_out, perm, keep


# ---------------------------------------------------------------------------
if __name__ == "__main__":
    key = jax.random.PRNGKey(0)
    N, C, ratio = 256, 32, 0.8
    kx, kw = jax.random.split(key, 2)

    # node features
    x = jax.random.normal(kx, (N, C), dtype=jnp.float32)

    # undirected ring graph: E = 2N symmetric directed edges
    s = jnp.arange(N, dtype=jnp.int32)
    t = (s + 1) % N
    edge_index = jnp.concatenate(
        [jnp.stack([s, t]), jnp.stack([t, s])], axis=1)        # [2, 512]

    # GCNConv(in_channels=C, out_channels=1) parameters (deterministic init)
    w = jax.random.normal(kw, (C, 1), dtype=jnp.float32) * (1.0 / math.sqrt(C))
    b = jnp.zeros((1, 1), dtype=jnp.float32)                   # PyG bias init = zeros

    x_out, ei_out, ea_out, batch_out, perm, keep = sag_pool(
        x, edge_index, None, w, b, ratio, block_rows=64, block_k=64)
    jax.block_until_ready((x_out, ei_out, batch_out, perm, keep))

    # Pure-JAX reference check (dense normalized adjacency, same perm).
    a_ref = (jnp.zeros((N, N), jnp.float32).at[edge_index[1], edge_index[0]].add(1.0)
             + jnp.eye(N, dtype=jnp.float32))
    deg_ref = a_ref.sum(axis=1)
    dis_ref = jnp.where(deg_ref > 0.0, lax.rsqrt(deg_ref), 0.0)
    a_norm_ref = dis_ref[:, None] * a_ref * dis_ref[None, :]
    score_ref = a_norm_ref @ (x @ w) + b
    x_out_ref = x[perm] * jnp.tanh(score_ref[perm, 0])[:, None]
    assert jnp.allclose(x_out, x_out_ref, rtol=2e-3, atol=2e-3), "mismatch vs reference"

    print("KERNEL_OK")
</pallas_src>

<mosaic_0001>
module attributes {stable_mosaic.version = 11 : i64} {
  func.func @_gcn_score_kernel(%arg0: i32, %arg1: memref<64x256xf32, #tpu.memory_space<vmem>>, %arg2: memref<256x1xf32, #tpu.memory_space<vmem>>, %arg3: memref<64x1xf32, #tpu.memory_space<vmem>>, %arg4: memref<1x1xf32, #tpu.memory_space<smem>>, %arg5: memref<64x1xf32, #tpu.memory_space<vmem>>) attributes {dimension_semantics = [#tpu.dimension_semantics<parallel>], iteration_bounds = array<i64: 4>, scalar_prefetch = 0 : i64, scratch_operands = 0 : i64, tpu.core_type = #tpu.core_type<tc>, window_params = [{transform_indices = @transform_0, window_bounds = array<i64: 64, 256>}, {pipeline_mode = #tpu.pipeline_mode<synchronous>, transform_indices = @transform_1, window_bounds = array<i64: 256, 1>}, {transform_indices = @transform_2, window_bounds = array<i64: 64, 1>}, {transform_indices = @transform_3, window_bounds = array<i64: 1, 1>}, {transform_indices = @transform_4, window_bounds = array<i64: 64, 1>}]} {
    %c0 = arith.constant 0 : index
    %c0_0 = arith.constant 0 : index
    %0 = vector.load %arg1[%c0, %c0_0] : memref<64x256xf32, #tpu.memory_space<vmem>>, vector<64x256xf32>
    %c0_1 = arith.constant 0 : index
    %c0_2 = arith.constant 0 : index
    %1 = vector.load %arg2[%c0_1, %c0_2] : memref<256x1xf32, #tpu.memory_space<vmem>>, vector<256x1xf32>
    %cst = arith.constant dense<0.000000e+00> : vector<64x1xf32>
    %2 = tpu.matmul %0, %1, %cst {dimension_numbers = #tpu.dot_dimension_numbers<[1], [0], [0], [1], [0, 0, 1, 1], [], []>} : vector<64x256xf32>, vector<256x1xf32>, vector<64x1xf32> -> vector<64x1xf32>
    %c0_3 = arith.constant 0 : index
    %c0_4 = arith.constant 0 : index
    %3 = vector.load %arg3[%c0_3, %c0_4] : memref<64x1xf32, #tpu.memory_space<vmem>>, vector<64x1xf32>
    %4 = arith.mulf %3, %2 : vector<64x1xf32>
    %c0_5 = arith.constant 0 : index
    %c0_6 = arith.constant 0 : index
    %5 = memref.load %arg4[%c0_5, %c0_6] : memref<1x1xf32, #tpu.memory_space<smem>>
    %6 = vector.broadcast %5 : f32 to vector<64x1xf32>
    %7 = arith.addf %4, %6 : vector<64x1xf32>
    %c0_7 = arith.constant 0 : index
    %c0_8 = arith.constant 0 : index
    %8 = vector.load %arg5[%c0_7, %c0_8] : memref<64x1xf32, #tpu.memory_space<vmem>>, vector<64x1xf32>
    tpu.vector_store %arg5[%c0_7, %c0_8], %7 {strides = array<i32>} : memref<64x1xf32, #tpu.memory_space<vmem>>, vector<64x1xf32>,
    return
  }
  func.func @transform_0(%arg0: i32) -> (i32, i32) {
    %c0_i32 = arith.constant 0 : i32
    %c0_i32_0 = arith.constant 0 : i32
    return %arg0, %c0_i32 : i32, i32
  }
  func.func @transform_1(%arg0: i32) -> (i32, i32) {
    %c0_i32 = arith.constant 0 : i32
    %c0_i32_0 = arith.constant 0 : i32
    %c0_i32_1 = arith.constant 0 : i32
    return %c0_i32, %c0_i32_0 : i32, i32
  }
  func.func @transform_2(%arg0: i32) -> (i32, i32) {
    %c0_i32 = arith.constant 0 : i32
    %c0_i32_0 = arith.constant 0 : i32
    return %arg0, %c0_i32 : i32, i32
  }
  func.func @transform_3(%arg0: i32) -> (i32, i32) {
    %c0_i32 = arith.constant 0 : i32
    %c0_i32_0 = arith.constant 0 : i32
    %c0_i32_1 = arith.constant 0 : i32
    return %c0_i32, %c0_i32_0 : i32, i32
  }
  func.func @transform_4(%arg0: i32) -> (i32, i32) {
    %c0_i32 = arith.constant 0 : i32
    %c0_i32_0 = arith.constant 0 : i32
    return %arg0, %c0_i32 : i32, i32
  }
}

</mosaic_0001>

<bundles_post_ra>
// kernel: tpu_custom_call.1
= control target key start
LH: loop header
LB: loop body
LE: loop exit
PB: predicated region body
PF: predicated region fallthrough
CT: control target
= control target key end

     0   :  { %s646_s17 = smov 0   ;;  %s812_s0 = inlined_call_operand.vmem [shape: f32[256,256], index: 0, kind: input, shape index: {}]   ;;  %s813_s1 = inlined_call_operand.vmem [shape: f32[256,1], index: 1, kind: input, shape index: {}]   ;;  %s814_s2 = inlined_call_operand.vmem [shape: f32[256,1], index: 2, kind: input, shape index: {}]   ;;  %s815_s3 = inlined_call_operand.<no memory space> [shape: f32[1,1], index: 3, kind: input, shape index: {}]   ;;  %s816_s4 = inlined_call_operand.vmem [shape: f32[256,1], index: 4, kind: output, shape index: {}]  }
   0x1   :  { %9 = sst [smem:[#allocation2]] %s815_s3 }
   0x2 LB: > { %s483_s18 = sadd.s32 4294967295, %s616_s17   ;;  %p487_p0 = scmp.ge.s32.totalorder %s616_s17, 1  ;;  %s616_s17 = sphi %s646_s17, %s15_s17  }
   0x3   : > { %p176_p1 = scmp.lt.s32.totalorder %s616_s17, 5 }
   0x5   : > { %p177_p2 = pnand %p487_p0, %p176_p1 }
   0x6   : > { %v259_v0 = vld [vmem:[%s813_s1 + $0x80] sm:$0xff] (!%p177_p2)  ;;  %v260_v1 = vld [vmem:[%s813_s1 + $0x88] sm:$0xff] (!%p177_p2)  ;;  %s488_s24 = sshll.u32 (!%p177_p2), %s483_s18, 3  ;;  %v261_v5 = vld [vmem:[%s813_s1 + $0x90] sm:$0xff] (!%p177_p2)  ;;  %s396_s13 = sld [smem:[#allocation2]] (!%p177_p2)  ;;  %vm406_vm0 = vcmask (!%p177_p2), 7168  }
   0x7   : > { %180 = sbr.rel (%p177_p2) target bundleno = 274 (0x112), region = 36  ;;  %v243_v2 = vld [vmem:[%s813_s1] sm:$0xff] (!%p177_p2)  ;;  %v554_v3 = vpack.c.bf16 (!%p177_p2), %v260_v1, %v259_v0  ;;  %v244_v4 = vld [vmem:[%s813_s1 + $0x8] sm:$0xff] (!%p177_p2)  ;;  %v262_v6 = vld [vmem:[%s813_s1 + $0x98] sm:$0xff] (!%p177_p2)  ;;  %p209_p3 = scmp.lt.s32.totalorder (!%p177_p2), %s488_s24, 31 }
   0x8   : > { %v556_v7 = vpack.c.bf16 (!%p177_p2), %v244_v4, %v243_v2  ;;  %v558_v8 = vpack.c.bf16 (!%p177_p2), %v262_v6, %v261_v5  ;;  %v245_v9 = vld [vmem:[%s813_s1 + $0x10] sm:$0xff] (!%p177_p2)  ;;  %v246_v10 = vld [vmem:[%s813_s1 + $0x18] sm:$0xff] (!%p177_p2)  ;;  %v263_v11 = vld [vmem:[%s813_s1 + $0xa0] sm:$0xff] (!%p177_p2) }
   0x9   : > { %555 = vmatprep.subr.bf16.mxu0 (!%p177_p2), %v554_v3  ;;  %586 = vmatprep.subr.bf16.mxu1 (!%p177_p2), %v554_v3  ;;  %v264_v12 = vld [vmem:[%s813_s1 + $0xa8] sm:$0xff] (!%p177_p2)  ;;  %v560_v13 = vpack.c.bf16 (!%p177_p2), %v246_v10, %v245_v9  ;;  %v247_v15 = vld [vmem:[%s813_s1 + $0x20] sm:$0xff] (!%p177_p2)  ;;  %v265_v17 = vld [vmem:[%s813_s1 + $0xb0] sm:$0xff] (!%p177_p2) }
   0xa   : > { %557 = vmatpush3.bf16.msra.mxu0 (!%p177_p2), %v556_v7  ;;  %594 = vmatpush3.bf16.msra.mxu1 (!%p177_p2), %v556_v7  ;;  %v562_v14 = vpack.c.bf16 (!%p177_p2), %v264_v12, %v263_v11  ;;  %v248_v16 = vld [vmem:[%s813_s1 + $0x28] sm:$0xff] (!%p177_p2)  ;;  %v266_v18 = vld [vmem:[%s813_s1 + $0xb8] sm:$0xff] (!%p177_p2)  ;;  %v249_v21 = vld [vmem:[%s813_s1 + $0x30] sm:$0xff] (!%p177_p2) }
   0xb   : > { %559 = vmatprep.subr.bf16.mxu0 (!%p177_p2), %v558_v8  ;;  %587 = vmatprep.subr.bf16.mxu1 (!%p177_p2), %v558_v8  ;;  %v564_v19 = vpack.c.bf16 (!%p177_p2), %v248_v16, %v247_v15  ;;  %v566_v20 = vpack.c.bf16 (!%p177_p2), %v266_v18, %v265_v17  ;;  %v250_v22 = vld [vmem:[%s813_s1 + $0x38] sm:$0xff] (!%p177_p2)  ;;  %v267_v23 = vld [vmem:[%s813_s1 + $0xc0] sm:$0xff] (!%p177_p2)  ;;  %v268_v24 = vld [vmem:[%s813_s1 + $0xc8] sm:$0xff] (!%p177_p2) }
   0xc   : > { %v568_v27 = vpack.c.bf16 (!%p177_p2), %v250_v22, %v249_v21  ;;  %v570_v28 = vpack.c.bf16 (!%p177_p2), %v268_v24, %v267_v23  ;;  %v251_v29 = vld [vmem:[%s813_s1 + $0x40] sm:$0xff] (!%p177_p2)  ;;  %v252_v30 = vld [vmem:[%s813_s1 + $0x48] sm:$0xff] (!%p177_p2)  ;;  %v269_v31 = vld [vmem:[%s813_s1 + $0xd0] sm:$0xff] (!%p177_p2)  ;;  %v397_v8 = vstv (!%p177_p2), %s396_s13 }
   0xd   : > { %v270_v32 = vld [vmem:[%s813_s1 + $0xd8] sm:$0xff] (!%p177_p2)  ;;  %v572_v33 = vpack.c.bf16 (!%p177_p2), %v252_v30, %v251_v29  ;;  %v253_v35 = vld [vmem:[%s813_s1 + $0x50] sm:$0xff] (!%p177_p2)  ;;  %v271_v37 = vld [vmem:[%s813_s1 + $0xe0] sm:$0xff] (!%p177_p2) }
   0xe   : > { %s818_s24 = smov (!%p209_p3, %s488_s24), 31  ;;  %561 = vmatpush3.bf16.msra.mxu0 %v560_v13  ;;  %595 = vmatpush3.bf16.msra.mxu1 %v560_v13  ;;  %v574_v34 = vpack.c.bf16 %v270_v32, %v269_v31  ;;  %v254_v36 = vld [vmem:[%s813_s1 + $0x58] sm:$0xff]  ;;  %v272_v38 = vld [vmem:[%s813_s1 + $0xe8] sm:$0xff]  ;;  %v255_v41 = vld [vmem:[%s813_s1 + $0x60] sm:$0xff] }
   0xf   : > { %s497_s18 = sshll.u32 %s818_s24, 4  ;;  %563 = vmatprep.subr.bf16.mxu0 %v562_v14  ;;  %588 = vmatprep.subr.bf16.mxu1 %v562_v14  ;;  %v576_v39 = vpack.c.bf16 %v254_v36, %v253_v35  ;;  %v578_v40 = vpack.c.bf16 %v272_v38, %v271_v37  ;;  %v256_v42 = vld [vmem:[%s813_s1 + $0x68] sm:$0xff]  ;;  %v273_v43 = vld [vmem:[%s813_s1 + $0xf0] sm:$0xff]  ;;  %v274_v44 = vld [vmem:[%s813_s1 + $0xf8] sm:$0xff]  ;;  %s492_s12 = sshll.u32 %s818_s24, 3 }
  0x10   : > { %s702_s25 = scalar_lea.vmem %s812_s0, %s497_s18  ;;  %v580_v45 = vpack.c.bf16 %v256_v42, %v255_v41  ;;  %v582_v46 = vpack.c.bf16 %v274_v44, %v273_v43  ;;  %v257_v47 = vld [vmem:[%s813_s1 + $0x70] sm:$0xff]  ;;  %v258_v48 = vld [vmem:[%s813_s1 + $0x78] sm:$0xff]  ;;  %s778_s16 = scalar_lea.vmem %s814_s2, %s492_s12 }
  0x11   : > { %v228_v25 = vld [vmem:[%s702_s25 + $0x8] sm:$0xff]  ;;  %v584_v49 = vpack.c.bf16 %v258_v48, %v257_v47  ;;  %v227_v50 = vld [vmem:[%s702_s25] sm:$0xff]  ;;  %v230_v52 = vld [vmem:[%s702_s25 + $0x18] sm:$0xff]  ;;  %s785_s18 = scalar_lea.vmem %s816_s4, %s492_s12 }
  0x12   : > { %339 = vmatprep.mubr.f32.mxu0 %v228_v25  ;;  %v236_v26 = vld [vmem:[%s702_s25 + $0x48] sm:$0xff]  ;;  %565 = vmatpush3.bf16.msra.mxu0 %v564_v19  ;;  %v235_v51 = vld [vmem:[%s702_s25 + $0x40] sm:$0xff]  ;;  %v238_v53 = vld [vmem:[%s702_s25 + $0x58] sm:$0xff] }
  0x13   : > { %596 = vmatpush3.bf16.msra.mxu1 %v564_v19  ;;  %567 = vmatprep.subr.bf16.mxu0 %v566_v20  ;;  %v229_v54 = vld [vmem:[%s702_s25 + $0x10] sm:$0xff]  ;;  %v232_v56 = vld [vmem:[%s702_s25 + $0x28] sm:$0xff]  ;;  %v231_v58 = vld [vmem:[%s702_s25 + $0x20] sm:$0xff] }
  0x14   : > { %589 = vmatprep.subr.bf16.mxu1 %v566_v20  ;;  %359 = vmatprep.mubr.f32.mxu1 %v236_v26  ;;  %v237_v55 = vld [vmem:[%s702_s25 + $0x50] sm:$0xff]  ;;  %v240_v57 = vld [vmem:[%s702_s25 + $0x68] sm:$0xff]  ;;  %v239_v59 = vld [vmem:[%s702_s25 + $0x60] sm:$0xff] }
  0x15   : > { %v234_v60 = vld [vmem:[%s702_s25 + $0x38] sm:$0xff]  ;;  %v233_v62 = vld [vmem:[%s702_s25 + $0x30] sm:$0xff]  ;;  %v380_v3 = vld [vmem:[%s778_s16] sm:$0xff] }
  0x16   : > { %569 = vmatpush3.bf16.msra.mxu0 %v568_v27  ;;  %v242_v61 = vld [vmem:[%s702_s25 + $0x78] sm:$0xff]  ;;  %v241_v63 = vld [vmem:[%s702_s25 + $0x70] sm:$0xff]  ;;  %v384_v5 = vld [vmem:[%s778_s16 + $0x20] sm:$0xff] }
  0x17   : > { %597 = vmatpush3.bf16.msra.mxu1 %v568_v27  ;;  %571 = vmatprep.subr.bf16.mxu0 %v570_v28  ;;  %v381_v14 = vld [vmem:[%s778_s16 + $0x8] sm:$0xff]  ;;  %v382_v26 = vld [vmem:[%s778_s16 + $0x10] sm:$0xff]  ;;  %v383_v38 = vld [vmem:[%s778_s16 + $0x18] sm:$0xff] }
  0x18   : > { %590 = vmatprep.subr.bf16.mxu1 %v570_v28  ;;  %v385_v16 = vld [vmem:[%s778_s16 + $0x28] sm:$0xff]  ;;  %v386_v28 = vld [vmem:[%s778_s16 + $0x30] sm:$0xff] }
  0x1a   : > { %573 = vmatpush3.bf16.msra.mxu0 %v572_v33 }
  0x1b   : > { %598 = vmatpush3.bf16.msra.mxu1 %v572_v33  ;;  %575 = vmatprep.subr.bf16.mxu0 %v574_v34 }
  0x1c   : > { %591 = vmatprep.subr.bf16.mxu1 %v574_v34 }
  0x1e   : > { %577 = vmatpush3.bf16.msra.mxu0 %v576_v39 }
  0x1f   : > { %599 = vmatpush3.bf16.msra.mxu1 %v576_v39  ;;  %579 = vmatprep.subr.bf16.mxu0 %v578_v40 }
  0x20   : > { %592 = vmatprep.subr.bf16.mxu1 %v578_v40  ;;  %v387_v40 = vld [vmem:[%s778_s16 + $0x38] sm:$0xff] }
  0x22   : > { %581 = vmatpush3.bf16.msra.mxu0 %v580_v45 }
  0x23   : > { %600 = vmatpush3.bf16.msra.mxu1 %v580_v45  ;;  %583 = vmatprep.subr.bf16.mxu0 %v582_v46 }
  0x24   : > { %593 = vmatprep.subr.bf16.mxu1 %v582_v46 }
  0x26   : > { %585 = vmatpush3.bf16.msra.mxu0 %v584_v49 }
  0x27   : > { %601 = vmatpush3.bf16.msra.mxu1 %v584_v49 }
  0x29   : > { %340 = vmatmul.mubr.f32.vlgmr.msra.gmra.mrb[0].mxu0 %v227_v50 }
  0x2a   : > { %360 = vmatmul.mubr.f32.vlgmr.msra.gmra.mrb[0].mxu1 %v235_v51  ;;  %344 = vmatprep.mubr.f32.mxu0 %v230_v52 }
  0x2b   : > { %364 = vmatprep.mubr.f32.mxu1 %v238_v53 }
  0x2d   : > { %345 = vmatmul.mubr.f32.gmra.mrb[2].mxu0 %v229_v54 }
  0x2e   : > { %365 = vmatmul.mubr.f32.gmra.mrb[2].mxu1 %v237_v55  ;;  %349 = vmatprep.mubr.f32.mxu0 %v232_v56 }
  0x2f   : > { %369 = vmatprep.mubr.f32.mxu1 %v240_v57 }
  0x31   : > { %350 = vmatmul.mubr.f32.gmra.mrb[4].mxu0 %v231_v58 }
  0x32   : > { %370 = vmatmul.mubr.f32.gmra.mrb[4].mxu1 %v239_v59  ;;  %354 = vmatprep.mubr.f32.mxu0 %v234_v60 }
  0x33   : > { %374 = vmatprep.mubr.f32.mxu1 %v242_v61 }
  0x35   : > { %355 = vmatmul.mubr.f32.gmra.mrb[6].mxu0 %v233_v62 }
  0x36   : > { %375 = vmatmul.mubr.f32.gmra.mrb[6].mxu1 %v241_v63 }
  0xfc   : > { %v530_v0 = vpop.f32.mrb[0].mxu0 }
  0xfd   : > { %v542_v1 = vpop.f32.mrb[0].mxu1  ;;  %v531_v2 = vpop.f32.mrb[1].mxu0 }
  0xfe   : > { %v543_v4 = vpop.f32.mrb[1].mxu1  ;;  %v532_v6 = vadd.f32 %v531_v2, %v530_v0 }
  0xff   : > { %v544_v7 = vadd.f32 %v543_v4, %v542_v1 }
 0x100   : > { %v388_v9 = vmul.f32 %v532_v6, %v380_v3  ;;  %v533_v11 = vpop.f32.mrb[2].mxu0 }
 0x101   : > { %v392_v10 = vmul.f32 %v544_v7, %v384_v5  ;;  %v545_v12 = vpop.f32.mrb[2].mxu1  ;;  %v534_v13 = vpop.f32.mrb[3].mxu0 }
 0x102   : > { %v546_v15 = vpop.f32.mrb[3].mxu1  ;;  %v398_v17 = vadd.f32 %v397_v8, %v388_v9  ;;  %v535_v19 = vadd.f32 %v534_v13, %v533_v11 }
 0x103   : > { %v402_v18 = vadd.f32 %v397_v8, %v392_v10  ;;  %v547_v20 = vadd.f32 %v546_v15, %v545_v12 }
 0x104   : > { %407 = vst.msk [vmem:[%s785_s18] sm:$0xff] %vm406_vm0, %v398_v17  ;;  %v389_v21 = vmul.f32 %v535_v19, %v381_v14  ;;  %v536_v23 = vpop.f32.mrb[4].mxu0 }
 0x105   : > { %411 = vst.msk [vmem:[%s785_s18 + $0x20] sm:$0xff] %vm406_vm0, %v402_v18  ;;  %v393_v22 = vmul.f32 %v547_v20, %v385_v16  ;;  %v548_v24 = vpop.f32.mrb[4].mxu1  ;;  %v537_v25 = vpop.f32.mrb[5].mxu0 }
 0x106   : > { %v549_v27 = vpop.f32.mrb[5].mxu1  ;;  %v399_v29 = vadd.f32 %v397_v8, %v389_v21  ;;  %v538_v31 = vadd.f32 %v537_v25, %v536_v23 }
 0x107   : > { %v403_v30 = vadd.f32 %v397_v8, %v393_v22  ;;  %v550_v32 = vadd.f32 %v549_v27, %v548_v24 }
 0x108   : > { %408 = vst.msk [vmem:[%s785_s18 + $0x8] sm:$0xff] %vm406_vm0, %v399_v29  ;;  %v390_v33 = vmul.f32 %v538_v31, %v382_v26  ;;  %v539_v35 = vpop.f32.mrb[6].mxu0 }
 0x109   : > { %412 = vst.msk [vmem:[%s785_s18 + $0x28] sm:$0xff] %vm406_vm0, %v403_v30  ;;  %v394_v34 = vmul.f32 %v550_v32, %v386_v28  ;;  %v551_v36 = vpop.f32.mrb[6].mxu1  ;;  %v540_v37 = vpop.f32.mrb[7].mxu0 }
 0x10a   : > { %v552_v39 = vpop.f32.mrb[7].mxu1  ;;  %v400_v41 = vadd.f32 %v397_v8, %v390_v33  ;;  %v541_v43 = vadd.f32 %v540_v37, %v539_v35 }
 0x10b   : > { %v404_v42 = vadd.f32 %v397_v8, %v394_v34  ;;  %v553_v44 = vadd.f32 %v552_v39, %v551_v36 }
 0x10c   : > { %409 = vst.msk [vmem:[%s785_s18 + $0x10] sm:$0xff] %vm406_vm0, %v400_v41  ;;  %v391_v45 = vmul.f32 %v541_v43, %v383_v38 }
 0x10d   : > { %413 = vst.msk [vmem:[%s785_s18 + $0x30] sm:$0xff] %vm406_vm0, %v404_v42  ;;  %v395_v46 = vmul.f32 %v553_v44, %v387_v40 }
 0x10e   : > { %v401_v47 = vadd.f32 %v397_v8, %v391_v45 }
 0x10f   : > { %v405_v48 = vadd.f32 %v397_v8, %v395_v46 }
 0x110   : > { %410 = vst.msk [vmem:[%s785_s18 + $0x18] sm:$0xff] %vm406_vm0, %v401_v47 }
 0x111   : > { %414 = vst.msk [vmem:[%s785_s18 + $0x38] sm:$0xff] %vm406_vm0, %v405_v48 }
 0x112 PF: > { %s15_s17 = sadd.s32 1, %s616_s17  }
 0x113   : > { %p12_p4 = scmp.ge.s32.totalorder %s15_s17, 6  }
 0x115   :  { %14 = sbr.rel (!%p12_p4) target bundleno = 2 (0x2), region = 69 }

</bundles_post_ra>
